<compile_context>
chip_gen: v6e
topology: v6e:2x2x1
jax: 0.10.0
libtpu: 0.0.40
codegen_flags: <defaults>
</compile_context>

<pallas_src>
import functools

import jax
import jax.numpy as jnp
from jax.experimental import pallas as pl
from jax.experimental.pallas import tpu as pltpu

HIDDEN = 112   # LSTM hidden size (fixed by the module)
MID = 14       # lin1 output size (fixed by the module)


def _round_up(x, m):
    return (x + m - 1) // m * m


# -----------------------------------------------------------------------------
# Kernel
# -----------------------------------------------------------------------------
def dqn_kernel(x_ref, h0_ref, c0_ref, w_ref, b_ref,
               q_ref, h1_ref, c1_ref, *, in_pad, out_pad):
    """Fused lin1+ReLU -> LSTM cell (1 step) -> lin3+Softplus.

    w_ref rows:   [0, in_pad)            lin1 weight (lanes 0:128, cols>=MID are 0)
                  [in_pad, in_pad+256)   fused gate weight (y1 block | h0 block)
                  [in_pad+256, +384)     lin3 weight (lanes 0:out_pad)
    b_ref rows:   0 = lin1 bias, 1 = pre-summed gate bias, 2 = lin3 bias.
    Gate lane order inside the 512 gate lanes: [i, f, o, g] (128 each).
    """
    r_g = in_pad
    r_3 = in_pad + 256

    x = x_ref[...]
    h0 = h0_ref[...]
    c0 = c0_ref[...]
    biases = b_ref[...]

    # lin1 + ReLU  (lane-dense 128-wide; lanes >= MID stay exactly 0)
    y1 = jnp.maximum(
        jnp.dot(x, w_ref[0:in_pad, 0:128], preferred_element_type=jnp.float32)
        + biases[0:1, 0:128],
        0.0)

    # single fused LSTM gate matmul: (B,256) @ (256,512) -> one MXU push/drain
    zin = jnp.concatenate([y1, h0], axis=1)          # lane-aligned 128|128 concat
    gates = (jnp.dot(zin, w_ref[r_g:r_g + 256, 0:512],
                     preferred_element_type=jnp.float32)
             + biases[1:2, 0:512])

    # gate order [i, f, o, g]: one wide sigmoid, one tanh
    sig = jax.nn.sigmoid(gates[:, 0:384])
    i_g = sig[:, 0:128]
    f_g = sig[:, 128:256]
    o_g = sig[:, 256:384]
    g_g = jnp.tanh(gates[:, 384:512])

    c1 = f_g * c0 + i_g * g_g                        # padded lanes stay 0
    h1 = o_g * jnp.tanh(c1)

    # lin3 + Softplus (PyTorch threshold=20; keep dead branch finite)
    z = (jnp.dot(h1, w_ref[r_3:r_3 + 128, 0:out_pad],
                 preferred_element_type=jnp.float32)
         + biases[2:3, 0:out_pad])
    q_ref[...] = jnp.where(z > 20.0, z, jnp.log1p(jnp.exp(jnp.minimum(z, 20.0))))
    h1_ref[...] = h1
    c1_ref[...] = c1


# -----------------------------------------------------------------------------
# Parameters: raw (PyTorch-equivalent, used by the reference) and packed (kernel)
# -----------------------------------------------------------------------------
def make_raw_params(key, n_inputs, n_outputs):
    ks = jax.random.split(key, 8)
    u = lambda k, shape, bound: jax.random.uniform(
        k, shape, jnp.float32, minval=-bound, maxval=bound)
    k1 = 1.0 / jnp.sqrt(n_inputs)
    kl = 1.0 / jnp.sqrt(HIDDEN)
    k3 = 1.0 / jnp.sqrt(HIDDEN)
    return {
        "w1": u(ks[0], (n_inputs, MID), k1),          # (inputs, 14), transposed
        "b1": u(ks[1], (1, MID), k1),
        "wih": u(ks[2], (4, MID, HIDDEN), kl),        # per-gate (i, f, g, o)
        "bih": u(ks[3], (4, 1, HIDDEN), kl),
        "whh": u(ks[4], (4, HIDDEN, HIDDEN), kl),
        "bhh": u(ks[5], (4, 1, HIDDEN), kl),
        "w3": u(ks[6], (HIDDEN, n_outputs), k3),      # (112, outputs), transposed
        "b3": u(ks[7], (1, n_outputs), k3),
    }


def pack_params(raw, n_inputs, n_outputs):
    """Pack all weights into one lane-dense (K, 512) matrix + one (8, 512) bias."""
    in_pad = _round_up(n_inputs, 128)
    out_pad = _round_up(n_outputs, 128)
    n_lanes = max(512, out_pad)
    k_total = in_pad + 256 + 128

    W = jnp.zeros((k_total, n_lanes), jnp.float32)
    b = jnp.zeros((8, n_lanes), jnp.float32)

    # lin1
    W = W.at[:n_inputs, :MID].set(raw["w1"])
    b = b.at[0, :MID].set(raw["b1"][0])

    # fused LSTM gate weight; reorder PyTorch (i, f, g, o) -> packed (i, f, o, g)
    order = (0, 1, 3, 2)
    for blk, k in enumerate(order):
        lo = 128 * blk
        hi = lo + HIDDEN
        W = W.at[in_pad:in_pad + MID, lo:hi].set(raw["wih"][k])
        W = W.at[in_pad + 128:in_pad + 128 + HIDDEN, lo:hi].set(raw["whh"][k])
        b = b.at[1, lo:hi].set(raw["bih"][k][0] + raw["bhh"][k][0])

    # lin3
    r0 = in_pad + 256
    W = W.at[r0:r0 + HIDDEN, :n_outputs].set(raw["w3"])
    b = b.at[2, :n_outputs].set(raw["b3"][0])

    return {"W": W, "b": b}


# -----------------------------------------------------------------------------
# Forward wrapper (PyTorch-shaped API)
# -----------------------------------------------------------------------------
@functools.partial(jax.jit, static_argnames=("n_outputs",))
def dqn_forward(x, hidden, params, n_outputs):
    """x: (B, inputs); hidden = (h0, c0), each reshapeable to (B, 112).
    Returns (out (1, B, outputs), (h1 (1, B, 112), c1 (1, B, 112)))."""
    B, n_in = x.shape
    W = params["W"]
    in_pad = W.shape[0] - 384
    out_pad = _round_up(n_outputs, 128)

    # lane-dense inputs (pad with zeros; padded lanes provably stay zero)
    x_p = jnp.pad(x.astype(jnp.float32), ((0, 0), (0, in_pad - n_in)))
    h0 = jnp.pad(hidden[0].reshape(B, HIDDEN).astype(jnp.float32),
                 ((0, 0), (0, 128 - HIDDEN)))
    c0 = jnp.pad(hidden[1].reshape(B, HIDDEN).astype(jnp.float32),
                 ((0, 0), (0, 128 - HIDDEN)))

    vmem = pl.BlockSpec(memory_space=pltpu.MemorySpace.VMEM)
    q, h1, c1 = pl.pallas_call(
        functools.partial(dqn_kernel, in_pad=in_pad, out_pad=out_pad),
        out_shape=(
            jax.ShapeDtypeStruct((B, out_pad), jnp.float32),
            jax.ShapeDtypeStruct((B, 128), jnp.float32),
            jax.ShapeDtypeStruct((B, 128), jnp.float32),
        ),
        in_specs=[vmem] * 5,
        out_specs=(vmem, vmem, vmem),
    )(x_p, h0, c0, W, params["b"])

    out = q[:, :n_outputs].reshape(1, B, n_outputs)
    return out, (h1[:, :HIDDEN].reshape(1, B, HIDDEN),
                 c1[:, :HIDDEN].reshape(1, B, HIDDEN))


# -----------------------------------------------------------------------------
# Pure-JAX reference (identical math, raw params) for verification
# -----------------------------------------------------------------------------
def dqn_reference(x, hidden, raw):
    B = x.shape[0]
    h0 = hidden[0].reshape(B, HIDDEN)
    c0 = hidden[1].reshape(B, HIDDEN)
    y1 = jnp.maximum(x @ raw["w1"] + raw["b1"], 0.0)
    g = [y1 @ raw["wih"][k] + raw["bih"][k] + h0 @ raw["whh"][k] + raw["bhh"][k]
         for k in range(4)]
    i_g, f_g = jax.nn.sigmoid(g[0]), jax.nn.sigmoid(g[1])
    g_g, o_g = jnp.tanh(g[2]), jax.nn.sigmoid(g[3])
    c1 = f_g * c0 + i_g * g_g
    h1 = o_g * jnp.tanh(c1)
    z = h1 @ raw["w3"] + raw["b3"]
    out = jnp.where(z > 20.0, z, jnp.log1p(jnp.exp(z)))
    n_out = raw["w3"].shape[1]
    return out.reshape(1, B, n_out), (h1.reshape(1, B, HIDDEN),
                                      c1.reshape(1, B, HIDDEN))


if __name__ == "__main__":
    key = jax.random.PRNGKey(0)
    k_p, k_x, k_h, k_c = jax.random.split(key, 4)

    B, N_IN, N_OUT = 2, 16, 8
    raw = make_raw_params(k_p, N_IN, N_OUT)
    params = pack_params(raw, N_IN, N_OUT)

    x = jax.random.normal(k_x, (B, N_IN), jnp.float32)
    h0 = jax.random.normal(k_h, (1, B, HIDDEN), jnp.float32)
    c0 = jax.random.normal(k_c, (1, B, HIDDEN), jnp.float32)

    out, (h1, c1) = dqn_forward(x, (h0, c0), params, n_outputs=N_OUT)
    jax.block_until_ready((out, h1, c1))

    ref_out, (ref_h1, ref_c1) = dqn_reference(x, (h0, c0), raw)
    assert out.shape == (1, B, N_OUT)
    assert h1.shape == (1, B, HIDDEN) and c1.shape == (1, B, HIDDEN)
    assert jnp.allclose(out, ref_out, atol=2e-5, rtol=2e-5)
    assert jnp.allclose(h1, ref_h1, atol=2e-5, rtol=2e-5)
    assert jnp.allclose(c1, ref_c1, atol=2e-5, rtol=2e-5)

    print("KERNEL_OK")
</pallas_src>

<mosaic_0001>
module attributes {stable_mosaic.version = 11 : i64} {
  func.func @dqn_kernel(%arg0: memref<2x128xf32, #tpu.memory_space<vmem>>, %arg1: memref<2x128xf32, #tpu.memory_space<vmem>>, %arg2: memref<2x128xf32, #tpu.memory_space<vmem>>, %arg3: memref<512x512xf32, #tpu.memory_space<vmem>>, %arg4: memref<8x512xf32, #tpu.memory_space<vmem>>, %arg5: memref<2x128xf32, #tpu.memory_space<vmem>>, %arg6: memref<2x128xf32, #tpu.memory_space<vmem>>, %arg7: memref<2x128xf32, #tpu.memory_space<vmem>>) attributes {dimension_semantics = [], scalar_prefetch = 0 : i64, scratch_operands = 0 : i64, tpu.core_type = #tpu.core_type<tc>} {
    %c0 = arith.constant 0 : index
    %c0_0 = arith.constant 0 : index
    %0 = vector.load %arg0[%c0, %c0_0] : memref<2x128xf32, #tpu.memory_space<vmem>>, vector<2x128xf32>
    %c0_1 = arith.constant 0 : index
    %c0_2 = arith.constant 0 : index
    %1 = vector.load %arg1[%c0_1, %c0_2] : memref<2x128xf32, #tpu.memory_space<vmem>>, vector<2x128xf32>
    %c0_3 = arith.constant 0 : index
    %c0_4 = arith.constant 0 : index
    %2 = vector.load %arg2[%c0_3, %c0_4] : memref<2x128xf32, #tpu.memory_space<vmem>>, vector<2x128xf32>
    %c0_5 = arith.constant 0 : index
    %c0_6 = arith.constant 0 : index
    %3 = vector.load %arg4[%c0_5, %c0_6] : memref<8x512xf32, #tpu.memory_space<vmem>>, vector<8x512xf32>
    %c0_7 = arith.constant 0 : index
    %c0_8 = arith.constant 0 : index
    %4 = vector.load %arg3[%c0_7, %c0_8] : memref<512x512xf32, #tpu.memory_space<vmem>>, vector<128x128xf32>
    %cst = arith.constant dense<0.000000e+00> : vector<2x128xf32>
    %5 = tpu.matmul %0, %4, %cst {dimension_numbers = #tpu.dot_dimension_numbers<[1], [0], [0], [1], [0, 0, 1, 1], [], []>} : vector<2x128xf32>, vector<128x128xf32>, vector<2x128xf32> -> vector<2x128xf32>
    %6 = vector.extract_strided_slice %3 {offsets = [0, 0], sizes = [1, 128], strides = [1, 1]} : vector<8x512xf32> to vector<1x128xf32>
    %7 = vector.broadcast %6 : vector<1x128xf32> to vector<2x128xf32>
    %8 = arith.addf %5, %7 : vector<2x128xf32>
    %cst_9 = arith.constant 0.000000e+00 : f32
    %9 = vector.broadcast %cst_9 : f32 to vector<2x128xf32>
    %10 = arith.maximumf %8, %9 : vector<2x128xf32>
    %11 = tpu.concatenate %10, %1 in 1 : vector<2x128xf32>, vector<2x128xf32> -> vector<2x256xf32>
    %c128 = arith.constant 128 : index
    %c0_10 = arith.constant 0 : index
    %12 = vector.load %arg3[%c128, %c0_10] : memref<512x512xf32, #tpu.memory_space<vmem>>, vector<256x512xf32>
    %cst_11 = arith.constant dense<0.000000e+00> : vector<2x512xf32>
    %13 = tpu.matmul %11, %12, %cst_11 {dimension_numbers = #tpu.dot_dimension_numbers<[1], [0], [0], [1], [0, 0, 1, 1], [], []>} : vector<2x256xf32>, vector<256x512xf32>, vector<2x512xf32> -> vector<2x512xf32>
    %14 = vector.extract_strided_slice %3 {offsets = [1, 0], sizes = [1, 512], strides = [1, 1]} : vector<8x512xf32> to vector<1x512xf32>
    %15 = vector.broadcast %14 : vector<1x512xf32> to vector<2x512xf32>
    %16 = arith.addf %13, %15 : vector<2x512xf32>
    %17 = vector.extract_strided_slice %16 {offsets = [0, 0], sizes = [2, 384], strides = [1, 1]} : vector<2x512xf32> to vector<2x384xf32>
    %18 = arith.negf %17 : vector<2x384xf32>
    %19 = math.exp %18 : vector<2x384xf32>
    %cst_12 = arith.constant 1.000000e+00 : f32
    %20 = vector.broadcast %cst_12 : f32 to vector<2x384xf32>
    %21 = arith.addf %20, %19 : vector<2x384xf32>
    %22 = arith.divf %20, %21 : vector<2x384xf32>
    %23 = vector.extract_strided_slice %22 {offsets = [0, 0], sizes = [2, 128], strides = [1, 1]} : vector<2x384xf32> to vector<2x128xf32>
    %24 = vector.extract_strided_slice %22 {offsets = [0, 128], sizes = [2, 128], strides = [1, 1]} : vector<2x384xf32> to vector<2x128xf32>
    %25 = vector.extract_strided_slice %22 {offsets = [0, 256], sizes = [2, 128], strides = [1, 1]} : vector<2x384xf32> to vector<2x128xf32>
    %26 = vector.extract_strided_slice %16 {offsets = [0, 384], sizes = [2, 128], strides = [1, 1]} : vector<2x512xf32> to vector<2x128xf32>
    %27 = math.tanh %26 : vector<2x128xf32>
    %28 = arith.mulf %24, %2 : vector<2x128xf32>
    %29 = arith.mulf %23, %27 : vector<2x128xf32>
    %30 = arith.addf %28, %29 : vector<2x128xf32>
    %31 = math.tanh %30 : vector<2x128xf32>
    %32 = arith.mulf %25, %31 : vector<2x128xf32>
    %c384 = arith.constant 384 : index
    %c0_13 = arith.constant 0 : index
    %33 = vector.load %arg3[%c384, %c0_13] : memref<512x512xf32, #tpu.memory_space<vmem>>, vector<128x128xf32>
    %cst_14 = arith.constant dense<0.000000e+00> : vector<2x128xf32>
    %34 = tpu.matmul %32, %33, %cst_14 {dimension_numbers = #tpu.dot_dimension_numbers<[1], [0], [0], [1], [0, 0, 1, 1], [], []>} : vector<2x128xf32>, vector<128x128xf32>, vector<2x128xf32> -> vector<2x128xf32>
    %35 = vector.extract_strided_slice %3 {offsets = [2, 0], sizes = [1, 128], strides = [1, 1]} : vector<8x512xf32> to vector<1x128xf32>
    %36 = vector.broadcast %35 : vector<1x128xf32> to vector<2x128xf32>
    %37 = arith.addf %34, %36 : vector<2x128xf32>
    %cst_15 = arith.constant 2.000000e+01 : f32
    %38 = vector.broadcast %cst_15 : f32 to vector<2x128xf32>
    %39 = arith.cmpf ogt, %37, %38 : vector<2x128xf32>
    %cst_16 = arith.constant 2.000000e+01 : f32
    %40 = vector.broadcast %cst_16 : f32 to vector<2x128xf32>
    %41 = arith.minimumf %37, %40 : vector<2x128xf32>
    %42 = math.exp %41 : vector<2x128xf32>
    %43 = math.log1p %42 : vector<2x128xf32>
    %44 = arith.select %39, %37, %43 : vector<2x128xi1>, vector<2x128xf32>
    %c0_17 = arith.constant 0 : index
    %c0_18 = arith.constant 0 : index
    %45 = vector.load %arg5[%c0_17, %c0_18] : memref<2x128xf32, #tpu.memory_space<vmem>>, vector<2x128xf32>
    tpu.vector_store %arg5[%c0_17, %c0_18], %44 {strides = array<i32>} : memref<2x128xf32, #tpu.memory_space<vmem>>, vector<2x128xf32>,
    %c0_19 = arith.constant 0 : index
    %c0_20 = arith.constant 0 : index
    %46 = vector.load %arg6[%c0_19, %c0_20] : memref<2x128xf32, #tpu.memory_space<vmem>>, vector<2x128xf32>
    tpu.vector_store %arg6[%c0_19, %c0_20], %32 {strides = array<i32>} : memref<2x128xf32, #tpu.memory_space<vmem>>, vector<2x128xf32>,
    %c0_21 = arith.constant 0 : index
    %c0_22 = arith.constant 0 : index
    %47 = vector.load %arg7[%c0_21, %c0_22] : memref<2x128xf32, #tpu.memory_space<vmem>>, vector<2x128xf32>
    tpu.vector_store %arg7[%c0_21, %c0_22], %30 {strides = array<i32>} : memref<2x128xf32, #tpu.memory_space<vmem>>, vector<2x128xf32>,
    return
  }
}

</mosaic_0001>

<bundles_post_ra>
// kernel: dqn_forward.1
= control target key start
LH: loop header
LB: loop body
LE: loop exit
PB: predicated region body
PF: predicated region fallthrough
CT: control target
= control target key end

     0   :  { %13 = vsyncpa [#allocation3], 0  ;;  %s871_s0 = inlined_call_operand.vmem [shape: f32[2,128], index: 0, kind: input, shape index: {}]   ;;  %s872_s1 = inlined_call_operand.vmem [shape: f32[2,128], index: 1, kind: input, shape index: {}]   ;;  %s873_s2 = inlined_call_operand.vmem [shape: f32[2,128], index: 2, kind: input, shape index: {}]   ;;  %s874_s3 = inlined_call_operand.hbm [shape: f32[512,512], index: 3, kind: input, shape index: {}]   ;;  %s875_s4 = inlined_call_operand.hbm [shape: f32[8,512], index: 4, kind: input, shape index: {}]   ;;  %s876_s5 = inlined_call_operand.vmem [shape: f32[2,128], index: 5, kind: output, shape index: {0}]   ;;  %s877_s6 = inlined_call_operand.vmem [shape: f32[2,128], index: 6, kind: output, shape index: {1}]   ;;  %s878_s7 = inlined_call_operand.vmem [shape: f32[2,128], index: 7, kind: output, shape index: {2}]  }
   0x1   :  { %14 = vsyncpa [#allocation5], 0  ;;  %s755_s24 = smov [#allocation2]  }
   0x2   :  { %s26_s25 = sshll.u32 %s755_s24, 4  ;;  %s27_s25 = int_to_ptr.vmem [resolvable:$true] %s26_s25 }
   0x3   :  { %s719_s26 = scalar_lea.vmem %s27_s25, 32768  ;;  %p724_p1 = scmp.lt.s32.totalorder %s27_s25, %s27_s25 }
   0x4   :  { %p720_p0 = scmp.ne.s32.totalorder %s27_s25, %s719_s26  ;;  %p725_p2 = scmp.lt.s32.totalorder %s719_s26, %s719_s26 }
   0x6   :  { %p726_p3 = por %p725_p2, %p724_p1 }
   0x8   :  { %p727_p4 = pnand %p726_p3, %p720_p0 }
   0xa   :  { %730 = shalt.err (!%p727_p4)
}
   0xb   :  { %s756_s27 = smov 512   ;;  %s757_s28 = smov 32  }
   0xc   :  { %32 = dma.hbm_to_vmem [thread:$0]  %s874_s3, 32768, %s27_s25, [#allocation3], %s756_s27, %s756_s27, %s757_s28  }
   0xd   :  { %s758_s8 = smov [#allocation4]  }
   0xe   :  { %s39_s9 = sshll.u32 %s758_s8, 4  ;;  %s40_s9 = int_to_ptr.vmem [resolvable:$true] %s39_s9 }
   0xf   :  { %s739_s10 = scalar_lea.vmem %s40_s9, 512  ;;  %p744_p6 = scmp.lt.s32.totalorder %s40_s9, %s40_s9 }
  0x10   :  { %p740_p5 = scmp.ne.s32.totalorder %s40_s9, %s739_s10  ;;  %p745_p7 = scmp.lt.s32.totalorder %s739_s10, %s739_s10 }
  0x12   :  { %p746_p8 = por %p745_p7, %p744_p6 }
  0x14   :  { %p747_p9 = pnand %p746_p8, %p740_p5 }
  0x16   :  { %750 = shalt.err (!%p747_p9)
}
  0x17   :  { %42 = dma.hbm_to_vmem [thread:$0]  %s875_s4, 512, %s40_s9, [#allocation5]  }
  0x18   :  { %751 = dma.done.wait [#allocation3], 32768  }
  0x19   :  { %752 = vsyncadd [#allocation3], 4294934528 }
  0x1a   :  { %753 = dma.done.wait [#allocation5], 512  }
  0x1b   :  { %754 = vsyncadd [#allocation5], 4294966784  ;;  %v759_v0 = vmov 0.0   ;;  %vm760_vm0 = vmmov 0   ;;  %v71_v1 = vld [vmem:[#allocation2 + $0x1e0] sm:$0xff]  ;;  %v208_v5 = vld [vmem:[#allocation2 + $0x3e8] sm:$0xff] }
  0x1c   :  { %615 = vmatprep.subr.mxu0 %v759_v0  ;;  %647 = vmatprep.mubr.msk.f32.mxu0 %vm760_vm0, %v759_v0  ;;  %v70_v2 = vld [vmem:[#allocation2 + $0x1c0] sm:$0xff]  ;;  %v204_v8 = vld [vmem:[#allocation2 + $0x3c8] sm:$0xff]  ;;  %v210_v44 = vld [vmem:[#allocation2 + $0x3f8] sm:$0xff] }
  0x1d   :  { %616 = vmatpush3.msra.mxu0 %v71_v1  ;;  %v69_v3 = vld [vmem:[#allocation2 + $0x1a0] sm:$0xff]  ;;  %291 = vmatprep.subr.mxu1 %v208_v5  ;;  %v200_v11 = vld [vmem:[#allocation2 + $0x3a8] sm:$0xff]  ;;  %v209_v45 = vld [vmem:[#allocation2 + $0x3f0] sm:$0xff] }
  0x1e   :  { %617 = vmatprep.subr.mxu0 %v759_v0  ;;  %v68_v4 = vld [vmem:[#allocation2 + $0x180] sm:$0xff]  ;;  %v196_v13 = vld [vmem:[#allocation2 + $0x388] sm:$0xff]  ;;  %v206_v47 = vld [vmem:[#allocation2 + $0x3d8] sm:$0xff] }
  0x1f   :  { %618 = vmatpush3.msra.mxu0 %v70_v2  ;;  %v67_v6 = vld [vmem:[#allocation2 + $0x160] sm:$0xff]  ;;  %v192_v16 = vld [vmem:[#allocation2 + $0x368] sm:$0xff]  ;;  %v205_v49 = vld [vmem:[#allocation2 + $0x3d0] sm:$0xff] }
  0x20   :  { %619 = vmatprep.subr.mxu0 %v759_v0  ;;  %v207_v7 = vld [vmem:[#allocation2 + $0x3e0] sm:$0xff]  ;;  %v188_v19 = vld [vmem:[#allocation2 + $0x348] sm:$0xff]  ;;  %v202_v51 = vld [vmem:[#allocation2 + $0x3b8] sm:$0xff] }
  0x21   :  { %620 = vmatpush3.msra.mxu0 %v69_v3  ;;  %292 = vmatpush1.msra.mxu1 %v207_v7  ;;  %v203_v9 = vld [vmem:[#allocation2 + $0x3c0] sm:$0xff]  ;;  %v184_v22 = vld [vmem:[#allocation2 + $0x328] sm:$0xff]  ;;  %v201_v53 = vld [vmem:[#allocation2 + $0x3b0] sm:$0xff] }
  0x22   :  { %621 = vmatprep.subr.mxu0 %v759_v0  ;;  %v66_v10 = vld [vmem:[#allocation2 + $0x140] sm:$0xff]  ;;  %293 = vmatprep.subr.mxu1 %v204_v8  ;;  %v180_v25 = vld [vmem:[#allocation2 + $0x308] sm:$0xff]  ;;  %v198_v55 = vld [vmem:[#allocation2 + $0x398] sm:$0xff] }
  0x23   :  { %622 = vmatpush3.msra.mxu0 %v68_v4  ;;  %294 = vmatpush1.msra.mxu1 %v203_v9  ;;  %v199_v12 = vld [vmem:[#allocation2 + $0x3a0] sm:$0xff]  ;;  %v176_v28 = vld [vmem:[#allocation2 + $0x2e8] sm:$0xff]  ;;  %v197_v57 = vld [vmem:[#allocation2 + $0x390] sm:$0xff] }
  0x24   :  { %623 = vmatprep.subr.mxu0 %v759_v0  ;;  %v65_v14 = vld [vmem:[#allocation2 + $0x120] sm:$0xff]  ;;  %295 = vmatprep.subr.mxu1 %v200_v11  ;;  %v172_v31 = vld [vmem:[#allocation2 + $0x2c8] sm:$0xff]  ;;  %v194_v59 = vld [vmem:[#allocation2 + $0x378] sm:$0xff] }
  0x25   :  { %624 = vmatpush3.msra.mxu0 %v67_v6  ;;  %v195_v15 = vld [vmem:[#allocation2 + $0x380] sm:$0xff]  ;;  %296 = vmatpush1.msra.mxu1 %v199_v12  ;;  %v168_v34 = vld [vmem:[#allocation2 + $0x2a8] sm:$0xff]  ;;  %v193_v61 = vld [vmem:[#allocation2 + $0x370] sm:$0xff] }
  0x26   :  { %625 = vmatprep.subr.mxu0 %v759_v0  ;;  %v64_v17 = vld [vmem:[#allocation2 + $0x100] sm:$0xff]  ;;  %297 = vmatprep.subr.mxu1 %v196_v13  ;;  %v164_v37 = vld [vmem:[#allocation2 + $0x288] sm:$0xff]  ;;  %v190_v63 = vld [vmem:[#allocation2 + $0x358] sm:$0xff] }
  0x27   :  { %626 = vmatpush3.msra.mxu0 %v66_v10  ;;  %v191_v18 = vld [vmem:[#allocation2 + $0x360] sm:$0xff]  ;;  %298 = vmatpush1.msra.mxu1 %v195_v15  ;;  %v160_v40 = vld [vmem:[#allocation2 + $0x268] sm:$0xff]  ;;  %v189_v2 = vld [vmem:[#allocation2 + $0x350] sm:$0xff] }
  0x28   :  { %627 = vmatprep.subr.mxu0 %v759_v0  ;;  %v63_v20 = vld [vmem:[#allocation2 + $0xe0] sm:$0xff]  ;;  %299 = vmatprep.subr.mxu1 %v192_v16  ;;  %v156_v46 = vld [vmem:[#allocation2 + $0x248] sm:$0xff]  ;;  %v186_v4 = vld [vmem:[#allocation2 + $0x338] sm:$0xff] }
  0x29   :  { %628 = vmatpush3.msra.mxu0 %v65_v14  ;;  %v187_v21 = vld [vmem:[#allocation2 + $0x340] sm:$0xff]  ;;  %300 = vmatpush1.msra.mxu1 %v191_v18  ;;  %v152_v50 = vld [vmem:[#allocation2 + $0x228] sm:$0xff]  ;;  %v185_v6 = vld [vmem:[#allocation2 + $0x330] sm:$0xff] }
  0x2a   :  { %629 = vmatprep.subr.mxu0 %v759_v0  ;;  %v62_v23 = vld [vmem:[#allocation2 + $0xc0] sm:$0xff]  ;;  %301 = vmatprep.subr.mxu1 %v188_v19  ;;  %v148_v54 = vld [vmem:[#allocation2 + $0x208] sm:$0xff]  ;;  %v182_v8 = vld [vmem:[#allocation2 + $0x318] sm:$0xff] }
  0x2b   :  { %630 = vmatpush3.msra.mxu0 %v64_v17  ;;  %v183_v24 = vld [vmem:[#allocation2 + $0x320] sm:$0xff]  ;;  %302 = vmatpush1.msra.mxu1 %v187_v21  ;;  %v272_v58 = vld [vmem:[#allocation2 + $0x5e8] sm:$0xff]  ;;  %v181_v10 = vld [vmem:[#allocation2 + $0x310] sm:$0xff] }
  0x2c   :  { %631 = vmatprep.subr.mxu0 %v759_v0  ;;  %v61_v26 = vld [vmem:[#allocation2 + $0xa0] sm:$0xff]  ;;  %303 = vmatprep.subr.mxu1 %v184_v22  ;;  %v268_v62 = vld [vmem:[#allocation2 + $0x5c8] sm:$0xff]  ;;  %v178_v12 = vld [vmem:[#allocation2 + $0x2f8] sm:$0xff] }
  0x2d   :  { %632 = vmatpush3.msra.mxu0 %v63_v20  ;;  %v179_v27 = vld [vmem:[#allocation2 + $0x300] sm:$0xff]  ;;  %304 = vmatpush1.msra.mxu1 %v183_v24  ;;  %v264_v3 = vld [vmem:[#allocation2 + $0x5a8] sm:$0xff]  ;;  %v177_v14 = vld [vmem:[#allocation2 + $0x2f0] sm:$0xff] }
  0x2e   :  { %633 = vmatprep.subr.mxu0 %v759_v0  ;;  %v60_v29 = vld [vmem:[#allocation2 + $0x80] sm:$0xff]  ;;  %305 = vmatprep.subr.mxu1 %v180_v25  ;;  %v260_v7 = vld [vmem:[#allocation2 + $0x588] sm:$0xff]  ;;  %v174_v16 = vld [vmem:[#allocation2 + $0x2d8] sm:$0xff] }
  0x2f   :  { %634 = vmatpush3.msra.mxu0 %v62_v23  ;;  %v175_v30 = vld [vmem:[#allocation2 + $0x2e0] sm:$0xff]  ;;  %306 = vmatpush1.msra.mxu1 %v179_v27  ;;  %v256_v11 = vld [vmem:[#allocation2 + $0x568] sm:$0xff]  ;;  %v173_v18 = vld [vmem:[#allocation2 + $0x2d0] sm:$0xff] }
  0x30   :  { %635 = vmatprep.subr.mxu0 %v759_v0  ;;  %v59_v32 = vld [vmem:[#allocation2 + $0x60] sm:$0xff]  ;;  %307 = vmatprep.subr.mxu1 %v176_v28  ;;  %v252_v15 = vld [vmem:[#allocation2 + $0x548] sm:$0xff]  ;;  %v170_v20 = vld [vmem:[#allocation2 + $0x2b8] sm:$0xff] }
  0x31   :  { %636 = vmatpush3.msra.mxu0 %v61_v26  ;;  %v171_v33 = vld [vmem:[#allocation2 + $0x2c0] sm:$0xff]  ;;  %308 = vmatpush1.msra.mxu1 %v175_v30  ;;  %v248_v19 = vld [vmem:[#allocation2 + $0x528] sm:$0xff]  ;;  %v169_v22 = vld [vmem:[#allocation2 + $0x2b0] sm:$0xff] }
  0x32   :  { %637 = vmatprep.subr.mxu0 %v759_v0  ;;  %v58_v35 = vld [vmem:[#allocation2 + $0x40] sm:$0xff]  ;;  %309 = vmatprep.subr.mxu1 %v172_v31  ;;  %v244_v23 = vld [vmem:[#allocation2 + $0x508] sm:$0xff]  ;;  %v166_v24 = vld [vmem:[#allocation2 + $0x298] sm:$0xff] }
  0x33   :  { %638 = vmatpush3.msra.mxu0 %v60_v29  ;;  %v167_v36 = vld [vmem:[#allocation2 + $0x2a0] sm:$0xff]  ;;  %310 = vmatpush1.msra.mxu1 %v171_v33  ;;  %v165_v26 = vld [vmem:[#allocation2 + $0x290] sm:$0xff]  ;;  %v240_v27 = vld [vmem:[#allocation2 + $0x4e8] sm:$0xff] }
  0x34   :  { %639 = vmatprep.subr.mxu0 %v759_v0  ;;  %v57_v38 = vld [vmem:[#allocation2 + $0x20] sm:$0xff]  ;;  %311 = vmatprep.subr.mxu1 %v168_v34  ;;  %v162_v28 = vld [vmem:[#allocation2 + $0x278] sm:$0xff]  ;;  %v161_v30 = vld [vmem:[#allocation2 + $0x270] sm:$0xff] }
  0x35   :  { %640 = vmatpush3.msra.mxu0 %v59_v32  ;;  %v163_v39 = vld [vmem:[#allocation2 + $0x280] sm:$0xff]  ;;  %312 = vmatpush1.msra.mxu1 %v167_v36  ;;  %v236_v31 = vld [vmem:[#allocation2 + $0x4c8] sm:$0xff]  ;;  %v158_v32 = vld [vmem:[#allocation2 + $0x258] sm:$0xff] }
  0x36   :  { %641 = vmatprep.subr.mxu0 %v759_v0  ;;  %v56_v41 = vld [vmem:[#allocation2] sm:$0xff]  ;;  %313 = vmatprep.subr.mxu1 %v164_v37  ;;  %v157_v34 = vld [vmem:[#allocation2 + $0x250] sm:$0xff]  ;;  %v154_v36 = vld [vmem:[#allocation2 + $0x238] sm:$0xff] }
  0x37   :  { %642 = vmatpush3.msra.mxu0 %v58_v35  ;;  %v159_v42 = vld [vmem:[#allocation2 + $0x260] sm:$0xff]  ;;  %314 = vmatpush1.msra.mxu1 %v163_v39  ;;  %v232_v35 = vld [vmem:[#allocation2 + $0x4a8] sm:$0xff] }
  0x38   :  { %643 = vmatprep.subr.mxu0 %v759_v0  ;;  %v49_v43 = vld [vmem:[%s871_s0] sm:$0x3]  ;;  %315 = vmatprep.subr.mxu1 %v160_v40  ;;  %v228_v39 = vld [vmem:[#allocation2 + $0x488] sm:$0xff]  ;;  %v150_v40 = vld [vmem:[#allocation2 + $0x218] sm:$0xff] }
  0x39   :  { %644 = vmatpush3.msra.mxu0 %v57_v38  ;;  %316 = vmatpush1.msra.mxu1 %v159_v42  ;;  %v155_v48 = vld [vmem:[#allocation2 + $0x240] sm:$0xff]  ;;  %v153_v38 = vld [vmem:[#allocation2 + $0x230] sm:$0xff] }
  0x3a   :  { %645 = vmatprep.subr.mxu0 %v759_v0  ;;  %317 = vmatprep.subr.mxu1 %v156_v46  ;;  %v151_v52 = vld [vmem:[#allocation2 + $0x220] sm:$0xff]  ;;  %v149_v42 = vld [vmem:[#allocation2 + $0x210] sm:$0xff] }
  0x3b   :  { %646 = vmatpush3.msra.mxu0 %v56_v41  ;;  %318 = vmatpush1.msra.mxu1 %v155_v48  ;;  %v147_v56 = vld [vmem:[#allocation2 + $0x200] sm:$0xff]  ;;  %v273_v46 = vld [vmem:[#allocation2 + $0x5f0] sm:$0xff]  ;;  %v270_v48 = vld [vmem:[#allocation2 + $0x5d8] sm:$0xff] }
  0x3c   :  { %648 = vmatmul.mubr.f32.vlgmr.msra.gmra.mxu0 %v49_v43  ;;  %362 = vmatprep.subr.mxu0 %v210_v44  ;;  %v271_v60 = vld [vmem:[#allocation2 + $0x5e0] sm:$0xff]  ;;  %v224_v43 = vld [vmem:[#allocation2 + $0x468] sm:$0xff]  ;;  %v274_v44 = vld [vmem:[#allocation2 + $0x5f8] sm:$0xff] }
  0x3d   :  { %363 = vmatpush1.msra.mxu0 %v209_v45  ;;  %319 = vmatprep.subr.mxu1 %v152_v50  ;;  %v267_v1 = vld [vmem:[#allocation2 + $0x5c0] sm:$0xff]  ;;  %v266_v50 = vld [vmem:[#allocation2 + $0x5b8] sm:$0xff] }
  0x3e   :  { %364 = vmatprep.subr.mxu0 %v206_v47  ;;  %320 = vmatpush1.msra.mxu1 %v151_v52  ;;  %v263_v5 = vld [vmem:[#allocation2 + $0x5a0] sm:$0xff]  ;;  %v220_v47 = vld [vmem:[#allocation2 + $0x448] sm:$0xff]  ;;  %v262_v52 = vld [vmem:[#allocation2 + $0x598] sm:$0xff] }
  0x3f   :  { %365 = vmatpush1.msra.mxu0 %v205_v49  ;;  %321 = vmatprep.subr.mxu1 %v148_v54  ;;  %v259_v9 = vld [vmem:[#allocation2 + $0x580] sm:$0xff]  ;;  %v269_v49 = vld [vmem:[#allocation2 + $0x5d0] sm:$0xff]  ;;  %v258_v54 = vld [vmem:[#allocation2 + $0x578] sm:$0xff] }
  0x40   :  { %366 = vmatprep.subr.mxu0 %v202_v51  ;;  %322 = vmatpush1.msra.mxu1 %v147_v56  ;;  %v255_v13 = vld [vmem:[#allocation2 + $0x560] sm:$0xff]  ;;  %v265_v51 = vld [vmem:[#allocation2 + $0x5b0] sm:$0xff]  ;;  %v254_v56 = vld [vmem:[#allocation2 + $0x558] sm:$0xff] }
  0x41   :  { %367 = vmatpush1.msra.mxu0 %v201_v53  ;;  %323 = vmatprep.subr.mxu1 %v272_v58  ;;  %v251_v17 = vld [vmem:[#allocation2 + $0x540] sm:$0xff]  ;;  %v261_v53 = vld [vmem:[#allocation2 + $0x590] sm:$0xff]  ;;  %v250_v58 = vld [vmem:[#allocation2 + $0x538] sm:$0xff] }
  0x42   :  { %368 = vmatprep.subr.mxu0 %v198_v55  ;;  %324 = vmatpush2.msra.mxu1 %v271_v60  ;;  %v247_v21 = vld [vmem:[#allocation2 + $0x520] sm:$0xff]  ;;  %v257_v55 = vld [vmem:[#allocation2 + $0x570] sm:$0xff]  ;;  %v246_v60 = vld [vmem:[#allocation2 + $0x518] sm:$0xff] }
  0x43   :  { %369 = vmatpush1.msra.mxu0 %v197_v57  ;;  %325 = vmatprep.subr.mxu1 %v268_v62  ;;  %v243_v25 = vld [vmem:[#allocation2 + $0x500] sm:$0xff]  ;;  %v253_v57 = vld [vmem:[#allocation2 + $0x550] sm:$0xff]  ;;  %v242_v62 = vld [vmem:[#allocation2 + $0x4f8] sm:$0xff] }
  0x44   :  { %370 = vmatprep.subr.mxu0 %v194_v59  ;;  %326 = vmatpush2.msra.mxu1 %v267_v1  ;;  %v239_v29 = vld [vmem:[#allocation2 + $0x4e0] sm:$0xff]  ;;  %v249_v59 = vld [vmem:[#allocation2 + $0x530] sm:$0xff]  ;;  %v238_v1 = vld [vmem:[#allocation2 + $0x4d8] sm:$0xff] }
  0x45   :  { %371 = vmatpush1.msra.mxu0 %v193_v61  ;;  %327 = vmatprep.subr.mxu1 %v264_v3  ;;  %v235_v33 = vld [vmem:[#allocation2 + $0x4c0] sm:$0xff]  ;;  %v245_v61 = vld [vmem:[#allocation2 + $0x510] sm:$0xff]  ;;  %v234_v3 = vld [vmem:[#allocation2 + $0x4b8] sm:$0xff] }
  0x46   :  { %372 = vmatprep.subr.mxu0 %v190_v63  ;;  %328 = vmatpush2.msra.mxu1 %v263_v5  ;;  %v231_v37 = vld [vmem:[#allocation2 + $0x4a0] sm:$0xff]  ;;  %v241_v63 = vld [vmem:[#allocation2 + $0x4f0] sm:$0xff]  ;;  %v230_v5 = vld [vmem:[#allocation2 + $0x498] sm:$0xff] }
  0x47   :  { %373 = vmatpush1.msra.mxu0 %v189_v2  ;;  %329 = vmatprep.subr.mxu1 %v260_v7  ;;  %v227_v41 = vld [vmem:[#allocation2 + $0x480] sm:$0xff]  ;;  %v237_v2 = vld [vmem:[#allocation2 + $0x4d0] sm:$0xff]  ;;  %v226_v7 = vld [vmem:[#allocation2 + $0x478] sm:$0xff] }
  0x48   :  { %374 = vmatprep.subr.mxu0 %v186_v4  ;;  %330 = vmatpush2.msra.mxu1 %v259_v9  ;;  %v223_v45 = vld [vmem:[#allocation2 + $0x460] sm:$0xff]  ;;  %v233_v4 = vld [vmem:[#allocation2 + $0x4b0] sm:$0xff]  ;;  %v222_v9 = vld [vmem:[#allocation2 + $0x458] sm:$0xff] }
  0x49   :  { %375 = vmatpush1.msra.mxu0 %v185_v6  ;;  %331 = vmatprep.subr.mxu1 %v256_v11  ;;  %v229_v6 = vld [vmem:[#allocation2 + $0x490] sm:$0xff] }
  0x4a   :  { %376 = vmatprep.subr.mxu0 %v182_v8  ;;  %332 = vmatpush2.msra.mxu1 %v255_v13  ;;  %v225_v8 = vld [vmem:[#allocation2 + $0x470] sm:$0xff]  ;;  %v218_v13 = vld [vmem:[#allocation2 + $0x438] sm:$0xff] }
  0x4b   :  { %377 = vmatpush1.msra.mxu0 %v181_v10  ;;  %333 = vmatprep.subr.mxu1 %v252_v15  ;;  %v219_v10 = vld [vmem:[#allocation2 + $0x440] sm:$0xff]  ;;  %v221_v11 = vld [vmem:[#allocation2 + $0x450] sm:$0xff] }
  0x4c   :  { %378 = vmatprep.subr.mxu0 %v178_v12  ;;  %334 = vmatpush2.msra.mxu1 %v251_v17  ;;  %v216_v12 = vld [vmem:[#allocation2 + $0x428] sm:$0xff]  ;;  %v217_v15 = vld [vmem:[#allocation2 + $0x430] sm:$0xff]  ;;  %v214_v17 = vld [vmem:[#allocation2 + $0x418] sm:$0xff] }
  0x4d   :  { %379 = vmatpush1.msra.mxu0 %v177_v14  ;;  %335 = vmatprep.subr.mxu1 %v248_v19  ;;  %v215_v14 = vld [vmem:[#allocation2 + $0x420] sm:$0xff] }
  0x4e   :  { %380 = vmatprep.subr.mxu0 %v174_v16  ;;  %336 = vmatpush2.msra.mxu1 %v247_v21  ;;  %v212_v16 = vld [vmem:[#allocation2 + $0x408] sm:$0xff]  ;;  %v50_v19 = vld [vmem:[%s872_s1] sm:$0x3]  ;;  %v72_v21 = vlaneseq }
  0x4f   :  { %381 = vmatpush1.msra.mxu0 %v173_v18  ;;  %337 = vmatprep.subr.mxu1 %v244_v23  ;;  %v211_v18 = vld [vmem:[#allocation2 + $0x400] sm:$0xff] }
  0x50   :  { %382 = vmatprep.subr.mxu0 %v170_v20  ;;  %338 = vmatpush2.msra.mxu1 %v243_v25  ;;  %v213_v20 = vld [vmem:[#allocation2 + $0x410] sm:$0xff] }
  0x51   :  { %383 = vmatpush1.msra.mxu0 %v169_v22  ;;  %339 = vmatprep.subr.mxu1 %v240_v27  ;;  %v832_v22 = vshrl.u32 %v72_v21, 7 }
  0x52   :  { %384 = vmatprep.subr.mxu0 %v166_v24  ;;  %340 = vmatpush2.msra.mxu1 %v239_v29  ;;  %v835_v24 = vld [vmem:[#allocation4] sm:$0xff] }
  0x53   :  { %385 = vmatpush1.msra.mxu0 %v165_v26  ;;  %341 = vmatprep.subr.mxu1 %v236_v31  ;;  %v74_v23 = vsub.s32 0, %v832_v22  ;;  %v471_v31 = vld [vmem:[#allocation2 + $0x7c0] sm:$0xff] }
  0x54   :  { %386 = vmatprep.subr.mxu0 %v162_v28  ;;  %342 = vmatpush2.msra.mxu1 %v235_v33  ;;  %v469_v33 = vld [vmem:[#allocation2 + $0x780] sm:$0xff] }
  0x55   :  { %387 = vmatpush1.msra.mxu0 %v161_v30  ;;  %343 = vmatprep.subr.mxu1 %v232_v35  ;;  %v75_v25 = vrot.slane %v835_v24, %v74_v23  ;;  %v472_v30 = vld [vmem:[#allocation2 + $0x7e0] sm:$0xff] }
  0x56   :  { %388 = vmatprep.subr.mxu0 %v158_v32  ;;  %344 = vmatpush2.msra.mxu1 %v231_v37  ;;  %v470_v32 = vld [vmem:[#allocation2 + $0x7a0] sm:$0xff] }
  0x57   :  { %389 = vmatpush1.msra.mxu0 %v157_v34  ;;  %345 = vmatprep.subr.mxu1 %v228_v39  ;;  %v468_v34 = vld [vmem:[#allocation2 + $0x760] sm:$0xff] }
  0x58   :  { %390 = vmatprep.subr.mxu0 %v154_v36  ;;  %346 = vmatpush2.msra.mxu1 %v227_v41  ;;  %v467_v35 = vld [vmem:[#allocation2 + $0x740] sm:$0xff] }
  0x59   :  { %391 = vmatpush1.msra.mxu0 %v153_v38  ;;  %347 = vmatprep.subr.mxu1 %v224_v43  ;;  %v466_v36 = vld [vmem:[#allocation2 + $0x720] sm:$0xff] }
  0x5a   :  { %392 = vmatprep.subr.mxu0 %v150_v40  ;;  %348 = vmatpush2.msra.mxu1 %v223_v45  ;;  %v465_v37 = vld [vmem:[#allocation2 + $0x700] sm:$0xff] }
  0x5b   :  { %393 = vmatpush1.msra.mxu0 %v149_v42  ;;  %349 = vmatprep.subr.mxu1 %v220_v47  ;;  %v464_v38 = vld [vmem:[#allocation2 + $0x6e0] sm:$0xff]  ;;  %v53_v47 = vld [vmem:[#allocation4 + $0x8] sm:$0xff] }
  0x5c   :  { %394 = vmatprep.subr.mxu0 %v274_v44  ;;  %350 = vmatpush2.msra.mxu1 %v219_v10  ;;  %v463_v39 = vld [vmem:[#allocation2 + $0x6c0] sm:$0xff] }
  0x5d   :  { %395 = vmatpush2.msra.mxu0 %v273_v46  ;;  %351 = vmatprep.subr.mxu1 %v216_v12  ;;  %v462_v40 = vld [vmem:[#allocation2 + $0x6a0] sm:$0xff]  ;;  %v277_v46 = vsub.s32 1, %v832_v22 }
  0x5e   :  { %396 = vmatprep.subr.mxu0 %v270_v48  ;;  %352 = vmatpush2.msra.mxu1 %v215_v14  ;;  %v461_v41 = vld [vmem:[#allocation2 + $0x680] sm:$0xff] }
  0x5f   :  { %397 = vmatpush2.msra.mxu0 %v269_v49  ;;  %353 = vmatprep.subr.mxu1 %v212_v16  ;;  %v460_v42 = vld [vmem:[#allocation2 + $0x660] sm:$0xff]  ;;  %v278_v48 = vrot.slane %v835_v24, %v277_v46  ;;  %v282_v49 = vrot.slane %v53_v47, %v277_v46 }
  0x60   :  { %398 = vmatprep.subr.mxu0 %v266_v50  ;;  %354 = vmatpush2.msra.mxu1 %v211_v18  ;;  %v459_v43 = vld [vmem:[#allocation2 + $0x640] sm:$0xff] }
  0x61   :  { %399 = vmatpush2.msra.mxu0 %v265_v51  ;;  %355 = vmatprep.mubr.f32.mxu1 %v50_v19  ;;  %v458_v44 = vld [vmem:[#allocation2 + $0x620] sm:$0xff] }
  0x62   :  { %400 = vmatprep.subr.mxu0 %v262_v52  ;;  %426 = vmatprep.mubr.f32.mxu0 %v50_v19  ;;  %v457_v45 = vld [vmem:[#allocation2 + $0x600] sm:$0xff] }
  0x63   :  { %401 = vmatpush2.msra.mxu0 %v261_v53  ;;  %650 = vmatprep.subr.mxu1 %v759_v0 }
  0x64   :  { %402 = vmatprep.subr.mxu0 %v258_v54 }
  0x65   :  { %403 = vmatpush2.msra.mxu0 %v257_v55  ;;  %v54_v55 = vld [vmem:[#allocation4 + $0x10] sm:$0xff] }
  0x66   :  { %404 = vmatprep.subr.mxu0 %v254_v56 }
  0x67   :  { %405 = vmatpush2.msra.mxu0 %v253_v57  ;;  %v286_v57 = vrot.slane %v54_v55, %v277_v46 }
  0x68   :  { %406 = vmatprep.subr.mxu0 %v250_v58 }
  0x69   :  { %407 = vmatpush2.msra.mxu0 %v249_v59  ;;  %v55_v59 = vld [vmem:[#allocation4 + $0x18] sm:$0xff] }
  0x6a   :  { %408 = vmatprep.subr.mxu0 %v246_v60  ;;  %v290_v60 = vrot.slane %v55_v59, %v277_v46 }
  0x6b   :  { %409 = vmatpush2.msra.mxu0 %v245_v61 }
  0x6c   :  { %410 = vmatprep.subr.mxu0 %v242_v62 }
  0x6d   :  { %411 = vmatpush2.msra.mxu0 %v241_v63 }
  0x6e   :  { %412 = vmatprep.subr.mxu0 %v238_v1 }
  0x6f   :  { %413 = vmatpush2.msra.mxu0 %v237_v2 }
  0x70   :  { %414 = vmatprep.subr.mxu0 %v234_v3 }
  0x71   :  { %415 = vmatpush2.msra.mxu0 %v233_v4 }
  0x72   :  { %416 = vmatprep.subr.mxu0 %v230_v5 }
  0x73   :  { %417 = vmatpush2.msra.mxu0 %v229_v6 }
  0x74   :  { %418 = vmatprep.subr.mxu0 %v226_v7  ;;  %v51_v7 = vld [vmem:[%s873_s2] sm:$0x3] }
  0x75   :  { %419 = vmatpush2.msra.mxu0 %v225_v8 }
  0x76   :  { %420 = vmatprep.subr.mxu0 %v222_v9 }
  0x77   :  { %421 = vmatpush2.msra.mxu0 %v221_v11 }
  0x78   :  { %422 = vmatprep.subr.mxu0 %v218_v13 }
  0x79   :  { %423 = vmatpush2.msra.mxu0 %v217_v15 }
  0x7a   :  { %424 = vmatprep.subr.mxu0 %v214_v17  ;;  %v475_v17 = vsub.s32 2, %v832_v22 }
  0x7b   :  { %425 = vmatpush2.msra.mxu0 %v213_v20 }
  0x7c   :  { %v476_v18 = vrot.slane %v835_v24, %v475_v17 }
  0xfc   :  { %v142_v26 = vpop.f32.mrf.mxu0 }
  0xfd   :  { %v143_v27 = vadd.f32 %v142_v26, %v75_v25 }
  0xfe   :  { %v649_v28 = vpop.f32.mrf.mxu0 }
  0xff   :  { %v146_v29 = vmax.f32 %v143_v27, 0.0 }
 0x101   :  { %356 = vmatmul.mubr.f32.vlgmr.msra.gmra.mxu1 %v146_v29  ;;  %427 = vmatmul.mubr.f32.vlgmr.msra.gmra.mxu0 %v146_v29 }
 0x102   :  { %682 = vmatprep.mubr.msk.f32.mxu1 %vm760_vm0, %v759_v0  ;;  %651 = vmatpush3.msra.mxu1 %v472_v30 }
 0x103   :  { %652 = vmatprep.subr.mxu1 %v759_v0 }
 0x104   :  { %653 = vmatpush3.msra.mxu1 %v471_v31 }
 0x105   :  { %654 = vmatprep.subr.mxu1 %v759_v0 }
 0x106   :  { %655 = vmatpush3.msra.mxu1 %v470_v32 }
 0x107   :  { %656 = vmatprep.subr.mxu1 %v759_v0 }
 0x108   :  { %657 = vmatpush3.msra.mxu1 %v469_v33 }
 0x109   :  { %658 = vmatprep.subr.mxu1 %v759_v0 }
 0x10a   :  { %659 = vmatpush3.msra.mxu1 %v468_v34 }
 0x10b   :  { %660 = vmatprep.subr.mxu1 %v759_v0 }
 0x10c   :  { %661 = vmatpush3.msra.mxu1 %v467_v35 }
 0x10d   :  { %662 = vmatprep.subr.mxu1 %v759_v0 }
 0x10e   :  { %663 = vmatpush3.msra.mxu1 %v466_v36 }
 0x10f   :  { %664 = vmatprep.subr.mxu1 %v759_v0 }
 0x110   :  { %665 = vmatpush3.msra.mxu1 %v465_v37 }
 0x111   :  { %666 = vmatprep.subr.mxu1 %v759_v0 }
 0x112   :  { %667 = vmatpush3.msra.mxu1 %v464_v38 }
 0x113   :  { %668 = vmatprep.subr.mxu1 %v759_v0 }
 0x114   :  { %669 = vmatpush3.msra.mxu1 %v463_v39 }
 0x115   :  { %670 = vmatprep.subr.mxu1 %v759_v0 }
 0x116   :  { %671 = vmatpush3.msra.mxu1 %v462_v40 }
 0x117   :  { %672 = vmatprep.subr.mxu1 %v759_v0 }
 0x118   :  { %673 = vmatpush3.msra.mxu1 %v461_v41 }
 0x119   :  { %674 = vmatprep.subr.mxu1 %v759_v0 }
 0x11a   :  { %675 = vmatpush3.msra.mxu1 %v460_v42 }
 0x11b   :  { %676 = vmatprep.subr.mxu1 %v759_v0 }
 0x11c   :  { %677 = vmatpush3.msra.mxu1 %v459_v43 }
 0x11d   :  { %678 = vmatprep.subr.mxu1 %v759_v0 }
 0x11e   :  { %679 = vmatpush3.msra.mxu1 %v458_v44 }
 0x11f   :  { %680 = vmatprep.subr.mxu1 %v759_v0 }
 0x120   :  { %681 = vmatpush3.msra.mxu1 %v457_v45 }
 0x1c1   :  { %v357_v50 = vpop.f32.mrf.mxu1  ;;  %v428_v58 = vpop.f32.mrf.mxu0 }
 0x1c2   :  { %v358_v51 = vadd.f32 %v357_v50, %v278_v48  ;;  %v429_v0 = vadd.f32 %v428_v58, %v286_v57 }
 0x1c3   :  { %v359_v52 = vpop.f32.mrf.mxu1  ;;  %v430_v61 = vpop.f32.mrf.mxu0 }
 0x1c4   :  { %v578_v53 = vmul.f32 -1.442695, %v358_v51  ;;  %v360_v54 = vadd.f32 %v359_v52, %v282_v49  ;;  %v580_v62 = vmul.f32 -1.442695, %v429_v0  ;;  %v431_v1 = vadd.f32 %v430_v61, %v290_v60 }
 0x1c6   :  { %691 = vpow2.f32 %v578_v53  ;;  %v579_v56 = vmul.f32 -1.442695, %v360_v54 }
 0x1c8   :  { %693 = vpow2.f32 %v579_v56 }
 0x1c9   :  { %695 = vpow2.f32 %v580_v62 }
 0x1d3   :  { %v692_v63 = vpop.eup %691 }
 0x1d4   :  { %v442_v2 = vadd.f32 1.0, %v692_v63 }
 0x1d5   :  { %v694_v3 = vpop.eup %693 }
 0x1d6   :  { %697 = vrcp.f32 %v442_v2  ;;  %v443_v4 = vadd.f32 1.0, %v694_v3  ;;  %v696_v5 = vpop.eup %695 }
 0x1d7   :  { %699 = vtanh.f32 %v431_v1  ;;  %v444_v10 = vadd.f32 1.0, %v696_v5 }
 0x1d8   :  { %701 = vrcp.f32 %v443_v4 }
 0x1d9   :  { %703 = vrcp.f32 %v444_v10 }
 0x1e3   :  { %v698_v6 = vpop.eup %697 }
 0x1e4   :  { %v700_v8 = vpop.eup %699 }
 0x1e5   :  { %v702_v9 = vpop.eup %701  ;;  %v453_v12 = vmul.f32 %v700_v8, %v698_v6 }
 0x1e6   :  { %v452_v11 = vmul.f32 %v702_v9, %v51_v7  ;;  %v704_v14 = vpop.eup %703 }
 0x1e8   :  { %v454_v13 = vadd.f32 %v453_v12, %v452_v11 }
 0x1ea   :  { %705 = vtanh.f32 %v454_v13  ;;  %563 = vst [vmem:[%s878_s7] sm:$0x3] %v454_v13 }
 0x1f7   :  { %v706_v15 = vpop.eup %705 }
 0x1f8   :  { %v456_v16 = vmul.f32 %v706_v15, %v704_v14 }
 0x1fa   :  { %683 = vmatmul.mubr.f32.vlgmr.msra.gmra.mxu1 %v456_v16  ;;  %562 = vst [vmem:[%s877_s6] sm:$0x3] %v456_v16 }
 0x2ba   :  { %v543_v19 = vpop.f32.mrf.mxu1 }
 0x2bb   :  { %v544_v20 = vadd.f32 %v543_v19, %v476_v18 }
 0x2bc   :  { %v684_v21 = vpop.f32.mrf.mxu1 }
 0x2bd   :  { %v548_v23 = vmin.f32 %v544_v20, 20.0  ;;  %vm547_vm2 = vcmp.gt.f32.partialorder %v544_v20, 20.0 }
 0x2bf   :  { %v549_v25 = vmul.f32 1.442695, %v548_v23 }
 0x2c1   :  { %707 = vpow2.f32 %v549_v25 }
 0x2ce   :  { %v708_v26 = vpop.eup %707 }
 0x2cf   :  { %v551_v27 = vadd.f32 1.0, %v708_v26  ;;  %v554_v28 = vmul.f32 -0.5, %v708_v26  ;;  %v557_v30 = vand.u32 2147483647, %v708_v26 }
 0x2d1   :  { %709 = vlog2.f32 %v551_v27  ;;  %v555_v29 = vadd.f32 1.0, %v554_v28  ;;  %vm558_vm1 = vcmp.lt.f32.partialorder %v557_v30, 0.0004427343 }
 0x2d3   :  { %v556_v33 = vmul.f32 %v708_v26, %v555_v29 }
 0x2de   :  { %v710_v31 = vpop.eup %709 }
 0x2df   :  { %v553_v32 = vmul.f32 0.6931472, %v710_v31 }
 0x2e1   :  { %v559_v22 = vsel %vm558_vm1, %v556_v33, %v553_v32 }
 0x2e2   :  { %v560_v34 = vsel %vm547_vm2, %v544_v20, %v559_v22 }
 0x2e3   :  { %561 = vst [vmem:[%s876_s5] sm:$0x3] %v560_v34 }
 0x2e4   :  { %576 = vsyncpa [#allocation3], 1 }
 0x2e5   :  { %577 = vsyncpa [#allocation5], 1 }

</bundles_post_ra>
